<compile_context>
chip_gen: v7x
topology: tpu7x:2x2x1
jax: 0.10.0
libtpu: 0.0.40
codegen_flags: <defaults>
</compile_context>

<pallas_src>
import functools

import jax
import jax.numpy as jnp
from jax.experimental import pallas as pl
from jax.experimental.pallas import tpu as pltpu

EPS = 1e-6
SOFTPLUS_THRESHOLD = 20.0  # torch.nn.Softplus default threshold


def _round_up(v, m):
    return ((v + m - 1) // m) * m


def _gaussian_heads_kernel(x_ref, wm_ref, ws_ref, bm_ref, bs_ref,
                           mean_ref, std_ref):
    """One grid step: affine ensemble heads + softplus on the std head.

    x_ref    : (tn, C, thw)  VMEM  -- pixel tile, lane-dense along H*W
    wm_ref   : (E, C)        SMEM  -- mean-head weights (read as scalars)
    ws_ref   : (E, C)        SMEM  -- raw-std-head weights
    bm_ref   : (E,)          SMEM  -- mean-head biases
    bs_ref   : (E,)          SMEM  -- raw-std-head biases
    mean_ref : (E, tn, thw)  VMEM
    std_ref  : (E, tn, thw)  VMEM
    """
    num_e = mean_ref.shape[0]
    num_c = x_ref.shape[1]

    # Hoist the C channel slabs once; contraction dim is tiny (K = C), so the
    # "matmul" is scalar(SMEM) * vector MACs on the VPU and the MXU is skipped
    # entirely (the kernel is HBM-bound).
    xc = [x_ref[:, c, :] for c in range(num_c)]          # each (tn, thw)

    for e in range(num_e):
        # --- mean head: plain affine ------------------------------------
        m = xc[0] * wm_ref[e, 0]
        for c in range(1, num_c):
            m = m + xc[c] * wm_ref[e, c]
        mean_ref[e] = (m + bm_ref[e]).astype(mean_ref.dtype)

        # --- std head: affine -> Softplus(threshold=20) + eps ------------
        s = xc[0] * ws_ref[e, 0]
        for c in range(1, num_c):
            s = s + xc[c] * ws_ref[e, c]
        s = s + bs_ref[e]
        sp = jnp.where(s > SOFTPLUS_THRESHOLD, s, jnp.log1p(jnp.exp(s))) + EPS
        std_ref[e] = sp.astype(std_ref.dtype)


def _choose_tiles(n, c, e, hw):
    """Pick (tn, thw) so each grid step moves ~2 MiB of x + outputs, and for
    large problems the parallel grid has >=4 steps (dual-TC balance on v7x)."""
    per_col = 4 * (c + 2 * e)                    # bytes per (image, HW column)
    total_bytes = n * hw * per_col
    target_steps = max(1, min(total_bytes // (2 << 20), 1 << 14))
    if total_bytes >= (8 << 20):
        target_steps = max(target_steps, 4)

    # Prefer splitting along HW (keeps lane-dense tiles), then along N.
    s_hw = int(min(target_steps, max(1, hw // 128)))
    if s_hw <= 1:
        thw = hw                                  # full-dim block: always legal
    else:
        thw = max(128, _round_up(pl.cdiv(hw, s_hw), 128))
        if thw >= hw:
            thw = hw
    s_hw = pl.cdiv(hw, thw)

    s_n = pl.cdiv(target_steps, s_hw)
    if s_n <= 1 or n <= 8:
        tn = n                                    # block dim == full N: legal
    else:
        # multiple of 8 (legal partial tiles) or clamped to full N
        tn = min(n, max(8, _round_up(pl.cdiv(n, s_n), 8)))
    return tn, thw


@functools.partial(jax.jit, static_argnames=("out_dtype",))
def gaussian_ensemble_forward(x_nchw, weights, biases, *, out_dtype=jnp.float32):
    """
    x_nchw  : (N, C, H, W)  float32
    weights : (E, 2, C)     per-model 1x1-conv weight (out 0 = mean, 1 = raw std)
    biases  : (E, 2)        per-model bias
    returns : (means, stds), each (E, N, H, W)  -- GaussianDiagonalMixture params
    """
    e_models = weights.shape[0]
    n, c, h, w = x_nchw.shape
    hw = h * w

    # Contiguous, metadata-only reshape: no transpose / pad / extra HBM pass.
    x = x_nchw.reshape(n, c, hw)

    # Tiny per-head parameters go to SMEM and are read as scalars in-kernel.
    wm = weights[:, 0, :]            # (E, C)
    ws = weights[:, 1, :]            # (E, C)
    bm = biases[:, 0]                # (E,)
    bs = biases[:, 1]                # (E,)

    tn, thw = _choose_tiles(n, c, e_models, hw)
    grid = (pl.cdiv(n, tn), pl.cdiv(hw, thw))

    cost = pl.CostEstimate(
        flops=4 * e_models * c * n * hw,            # 2 heads * 2*C flops / elem
        transcendentals=2 * e_models * n * hw,      # exp + log1p, std head only
        bytes_accessed=4 * (n * c * hw + 2 * e_models * n * hw
                            + 2 * e_models * c + 2 * e_models),
    )

    means, stds = pl.pallas_call(
        _gaussian_heads_kernel,
        out_shape=(
            jax.ShapeDtypeStruct((e_models, n, hw), out_dtype),
            jax.ShapeDtypeStruct((e_models, n, hw), out_dtype),
        ),
        grid_spec=pltpu.PrefetchScalarGridSpec(
            num_scalar_prefetch=0,
            grid=grid,
            in_specs=[
                pl.BlockSpec((tn, c, thw), lambda ni, j: (ni, 0, j)),     # x
                pl.BlockSpec(memory_space=pltpu.MemorySpace.SMEM),        # wm
                pl.BlockSpec(memory_space=pltpu.MemorySpace.SMEM),        # ws
                pl.BlockSpec(memory_space=pltpu.MemorySpace.SMEM),        # bm
                pl.BlockSpec(memory_space=pltpu.MemorySpace.SMEM),        # bs
            ],
            out_specs=[
                pl.BlockSpec((e_models, tn, thw), lambda ni, j: (0, ni, j)),
                pl.BlockSpec((e_models, tn, thw), lambda ni, j: (0, ni, j)),
            ],
        ),
        compiler_params=pltpu.CompilerParams(
            dimension_semantics=("parallel", "parallel"),
            vmem_limit_bytes=48 * 1024 * 1024,
        ),
        cost_estimate=cost,
    )(x, wm, ws, bm, bs)

    # Trailing-dim split (H*W -> H, W) is metadata-only; no post-kernel copies.
    return (means.reshape(e_models, n, h, w),
            stds.reshape(e_models, n, h, w))


def _reference_forward(x_nchw, weights, biases):
    """Pure-JAX reference mirroring the PyTorch ensemble forward semantics."""
    y = jnp.einsum('eoc,nchw->eonhw', weights, x_nchw,
                   precision=jax.lax.Precision.HIGHEST) \
        + biases[:, :, None, None, None]
    raw_mean, raw_std = y[:, 0], y[:, 1]
    sp = jnp.where(raw_std > SOFTPLUS_THRESHOLD,
                   raw_std, jnp.log1p(jnp.exp(raw_std)))
    return raw_mean, sp + EPS


if __name__ == "__main__":
    key = jax.random.PRNGKey(0)
    k_x, k_w, k_b = jax.random.split(key, 3)

    N, C, H, W = 2, 4, 16, 16      # input shape (NCHW)
    E = 4                          # ensemble size

    x = jax.random.normal(k_x, (N, C, H, W), dtype=jnp.float32)
    # Deterministic synthetic model parameters (each model: 1x1 conv C -> 2).
    weights = 0.5 * jax.random.normal(k_w, (E, 2, C), dtype=jnp.float32)
    biases = 0.1 * jax.random.normal(k_b, (E, 2), dtype=jnp.float32)

    means, stds = gaussian_ensemble_forward(x, weights, biases)
    jax.block_until_ready((means, stds))

    ref_means, ref_stds = _reference_forward(x, weights, biases)
    assert means.shape == (E, N, H, W) and stds.shape == (E, N, H, W)
    assert bool(jnp.allclose(means, ref_means, atol=1e-5, rtol=1e-5))
    assert bool(jnp.allclose(stds, ref_stds, atol=1e-5, rtol=1e-5))
    assert bool(jnp.all(stds > 0.0))

    # TODO(synk): the optional `mask` argument (boolean indexing of predictions)
    # and GaussianDiagonalMixture's log-prob / sampling methods are not part of
    # the forward() math and are not implemented here.
    print("KERNEL_OK")
</pallas_src>

<mosaic_0001>
module attributes {stable_mosaic.version = 11 : i64} {
  func.func @_gaussian_heads_kernel(%arg0: i32, %arg1: i32, %arg2: memref<2x4x256xf32, #tpu.memory_space<vmem>>, %arg3: memref<4x4xf32, #tpu.memory_space<smem>>, %arg4: memref<4x4xf32, #tpu.memory_space<smem>>, %arg5: memref<4xf32, #tpu.memory_space<smem>>, %arg6: memref<4xf32, #tpu.memory_space<smem>>, %arg7: memref<4x2x256xf32, #tpu.memory_space<vmem>>, %arg8: memref<4x2x256xf32, #tpu.memory_space<vmem>>) attributes {dimension_semantics = [#tpu.dimension_semantics<parallel>, #tpu.dimension_semantics<parallel>], iteration_bounds = array<i64: 1, 1>, scalar_prefetch = 0 : i64, scratch_operands = 0 : i64, tpu.core_type = #tpu.core_type<tc>, window_params = [{transform_indices = @transform_0, window_bounds = array<i64: 2, 4, 256>}, {transform_indices = @transform_1, window_bounds = array<i64: 4, 4>}, {transform_indices = @transform_2, window_bounds = array<i64: 4, 4>}, {transform_indices = @transform_3, window_bounds = array<i64: 4>}, {transform_indices = @transform_4, window_bounds = array<i64: 4>}, {transform_indices = @transform_5, window_bounds = array<i64: 4, 2, 256>}, {transform_indices = @transform_6, window_bounds = array<i64: 4, 2, 256>}]} {
    %c0 = arith.constant 0 : index
    %c0_0 = arith.constant 0 : index
    %c0_1 = arith.constant 0 : index
    %0 = vector.load %arg2[%c0, %c0_0, %c0_1] : memref<2x4x256xf32, #tpu.memory_space<vmem>>, vector<2x1x256xf32>
    %1 = vector.shape_cast %0 : vector<2x1x256xf32> to vector<2x256xf32>
    %c0_2 = arith.constant 0 : index
    %c1 = arith.constant 1 : index
    %c0_3 = arith.constant 0 : index
    %2 = vector.load %arg2[%c0_2, %c1, %c0_3] : memref<2x4x256xf32, #tpu.memory_space<vmem>>, vector<2x1x256xf32>
    %3 = vector.shape_cast %2 : vector<2x1x256xf32> to vector<2x256xf32>
    %c0_4 = arith.constant 0 : index
    %c2 = arith.constant 2 : index
    %c0_5 = arith.constant 0 : index
    %4 = vector.load %arg2[%c0_4, %c2, %c0_5] : memref<2x4x256xf32, #tpu.memory_space<vmem>>, vector<2x1x256xf32>
    %5 = vector.shape_cast %4 : vector<2x1x256xf32> to vector<2x256xf32>
    %c0_6 = arith.constant 0 : index
    %c3 = arith.constant 3 : index
    %c0_7 = arith.constant 0 : index
    %6 = vector.load %arg2[%c0_6, %c3, %c0_7] : memref<2x4x256xf32, #tpu.memory_space<vmem>>, vector<2x1x256xf32>
    %7 = vector.shape_cast %6 : vector<2x1x256xf32> to vector<2x256xf32>
    %c0_8 = arith.constant 0 : index
    %c0_9 = arith.constant 0 : index
    %8 = memref.load %arg3[%c0_8, %c0_9] : memref<4x4xf32, #tpu.memory_space<smem>>
    %9 = vector.broadcast %8 : f32 to vector<2x256xf32>
    %10 = arith.mulf %1, %9 : vector<2x256xf32>
    %c0_10 = arith.constant 0 : index
    %c1_11 = arith.constant 1 : index
    %11 = memref.load %arg3[%c0_10, %c1_11] : memref<4x4xf32, #tpu.memory_space<smem>>
    %12 = vector.broadcast %11 : f32 to vector<2x256xf32>
    %13 = arith.mulf %3, %12 : vector<2x256xf32>
    %14 = arith.addf %10, %13 : vector<2x256xf32>
    %c0_12 = arith.constant 0 : index
    %c2_13 = arith.constant 2 : index
    %15 = memref.load %arg3[%c0_12, %c2_13] : memref<4x4xf32, #tpu.memory_space<smem>>
    %16 = vector.broadcast %15 : f32 to vector<2x256xf32>
    %17 = arith.mulf %5, %16 : vector<2x256xf32>
    %18 = arith.addf %14, %17 : vector<2x256xf32>
    %c0_14 = arith.constant 0 : index
    %c3_15 = arith.constant 3 : index
    %19 = memref.load %arg3[%c0_14, %c3_15] : memref<4x4xf32, #tpu.memory_space<smem>>
    %20 = vector.broadcast %19 : f32 to vector<2x256xf32>
    %21 = arith.mulf %7, %20 : vector<2x256xf32>
    %22 = arith.addf %18, %21 : vector<2x256xf32>
    %c0_16 = arith.constant 0 : index
    %23 = memref.load %arg5[%c0_16] : memref<4xf32, #tpu.memory_space<smem>>
    %24 = vector.broadcast %23 : f32 to vector<2x256xf32>
    %25 = arith.addf %22, %24 : vector<2x256xf32>
    %c0_17 = arith.constant 0 : index
    %c0_18 = arith.constant 0 : index
    %c0_19 = arith.constant 0 : index
    %26 = vector.load %arg7[%c0_17, %c0_18, %c0_19] : memref<4x2x256xf32, #tpu.memory_space<vmem>>, vector<1x2x256xf32>
    %27 = vector.shape_cast %26 : vector<1x2x256xf32> to vector<2x256xf32>
    %28 = vector.shape_cast %25 : vector<2x256xf32> to vector<1x2x256xf32>
    tpu.vector_store %arg7[%c0_17, %c0_18, %c0_19], %28 {strides = array<i32>} : memref<4x2x256xf32, #tpu.memory_space<vmem>>, vector<1x2x256xf32>,
    %c0_20 = arith.constant 0 : index
    %c0_21 = arith.constant 0 : index
    %29 = memref.load %arg4[%c0_20, %c0_21] : memref<4x4xf32, #tpu.memory_space<smem>>
    %30 = vector.broadcast %29 : f32 to vector<2x256xf32>
    %31 = arith.mulf %1, %30 : vector<2x256xf32>
    %c0_22 = arith.constant 0 : index
    %c1_23 = arith.constant 1 : index
    %32 = memref.load %arg4[%c0_22, %c1_23] : memref<4x4xf32, #tpu.memory_space<smem>>
    %33 = vector.broadcast %32 : f32 to vector<2x256xf32>
    %34 = arith.mulf %3, %33 : vector<2x256xf32>
    %35 = arith.addf %31, %34 : vector<2x256xf32>
    %c0_24 = arith.constant 0 : index
    %c2_25 = arith.constant 2 : index
    %36 = memref.load %arg4[%c0_24, %c2_25] : memref<4x4xf32, #tpu.memory_space<smem>>
    %37 = vector.broadcast %36 : f32 to vector<2x256xf32>
    %38 = arith.mulf %5, %37 : vector<2x256xf32>
    %39 = arith.addf %35, %38 : vector<2x256xf32>
    %c0_26 = arith.constant 0 : index
    %c3_27 = arith.constant 3 : index
    %40 = memref.load %arg4[%c0_26, %c3_27] : memref<4x4xf32, #tpu.memory_space<smem>>
    %41 = vector.broadcast %40 : f32 to vector<2x256xf32>
    %42 = arith.mulf %7, %41 : vector<2x256xf32>
    %43 = arith.addf %39, %42 : vector<2x256xf32>
    %c0_28 = arith.constant 0 : index
    %44 = memref.load %arg6[%c0_28] : memref<4xf32, #tpu.memory_space<smem>>
    %45 = vector.broadcast %44 : f32 to vector<2x256xf32>
    %46 = arith.addf %43, %45 : vector<2x256xf32>
    %cst = arith.constant 2.000000e+01 : f32
    %47 = vector.broadcast %cst : f32 to vector<2x256xf32>
    %48 = arith.cmpf ogt, %46, %47 : vector<2x256xf32>
    %49 = math.exp %46 : vector<2x256xf32>
    %50 = math.log1p %49 : vector<2x256xf32>
    %51 = arith.select %48, %46, %50 : vector<2x256xi1>, vector<2x256xf32>
    %cst_29 = arith.constant 9.99999997E-7 : f32
    %52 = vector.broadcast %cst_29 : f32 to vector<2x256xf32>
    %53 = arith.addf %51, %52 : vector<2x256xf32>
    %c0_30 = arith.constant 0 : index
    %c0_31 = arith.constant 0 : index
    %c0_32 = arith.constant 0 : index
    %54 = vector.load %arg8[%c0_30, %c0_31, %c0_32] : memref<4x2x256xf32, #tpu.memory_space<vmem>>, vector<1x2x256xf32>
    %55 = vector.shape_cast %54 : vector<1x2x256xf32> to vector<2x256xf32>
    %56 = vector.shape_cast %53 : vector<2x256xf32> to vector<1x2x256xf32>
    tpu.vector_store %arg8[%c0_30, %c0_31, %c0_32], %56 {strides = array<i32>} : memref<4x2x256xf32, #tpu.memory_space<vmem>>, vector<1x2x256xf32>,
    %c1_33 = arith.constant 1 : index
    %c0_34 = arith.constant 0 : index
    %57 = memref.load %arg3[%c1_33, %c0_34] : memref<4x4xf32, #tpu.memory_space<smem>>
    %58 = vector.broadcast %57 : f32 to vector<2x256xf32>
    %59 = arith.mulf %1, %58 : vector<2x256xf32>
    %c1_35 = arith.constant 1 : index
    %c1_36 = arith.constant 1 : index
    %60 = memref.load %arg3[%c1_35, %c1_36] : memref<4x4xf32, #tpu.memory_space<smem>>
    %61 = vector.broadcast %60 : f32 to vector<2x256xf32>
    %62 = arith.mulf %3, %61 : vector<2x256xf32>
    %63 = arith.addf %59, %62 : vector<2x256xf32>
    %c1_37 = arith.constant 1 : index
    %c2_38 = arith.constant 2 : index
    %64 = memref.load %arg3[%c1_37, %c2_38] : memref<4x4xf32, #tpu.memory_space<smem>>
    %65 = vector.broadcast %64 : f32 to vector<2x256xf32>
    %66 = arith.mulf %5, %65 : vector<2x256xf32>
    %67 = arith.addf %63, %66 : vector<2x256xf32>
    %c1_39 = arith.constant 1 : index
    %c3_40 = arith.constant 3 : index
    %68 = memref.load %arg3[%c1_39, %c3_40] : memref<4x4xf32, #tpu.memory_space<smem>>
    %69 = vector.broadcast %68 : f32 to vector<2x256xf32>
    %70 = arith.mulf %7, %69 : vector<2x256xf32>
    %71 = arith.addf %67, %70 : vector<2x256xf32>
    %c1_41 = arith.constant 1 : index
    %72 = memref.load %arg5[%c1_41] : memref<4xf32, #tpu.memory_space<smem>>
    %73 = vector.broadcast %72 : f32 to vector<2x256xf32>
    %74 = arith.addf %71, %73 : vector<2x256xf32>
    %c1_42 = arith.constant 1 : index
    %c0_43 = arith.constant 0 : index
    %c0_44 = arith.constant 0 : index
    %75 = vector.load %arg7[%c1_42, %c0_43, %c0_44] : memref<4x2x256xf32, #tpu.memory_space<vmem>>, vector<1x2x256xf32>
    %76 = vector.shape_cast %75 : vector<1x2x256xf32> to vector<2x256xf32>
    %77 = vector.shape_cast %74 : vector<2x256xf32> to vector<1x2x256xf32>
    tpu.vector_store %arg7[%c1_42, %c0_43, %c0_44], %77 {strides = array<i32>} : memref<4x2x256xf32, #tpu.memory_space<vmem>>, vector<1x2x256xf32>,
    %c1_45 = arith.constant 1 : index
    %c0_46 = arith.constant 0 : index
    %78 = memref.load %arg4[%c1_45, %c0_46] : memref<4x4xf32, #tpu.memory_space<smem>>
    %79 = vector.broadcast %78 : f32 to vector<2x256xf32>
    %80 = arith.mulf %1, %79 : vector<2x256xf32>
    %c1_47 = arith.constant 1 : index
    %c1_48 = arith.constant 1 : index
    %81 = memref.load %arg4[%c1_47, %c1_48] : memref<4x4xf32, #tpu.memory_space<smem>>
    %82 = vector.broadcast %81 : f32 to vector<2x256xf32>
    %83 = arith.mulf %3, %82 : vector<2x256xf32>
    %84 = arith.addf %80, %83 : vector<2x256xf32>
    %c1_49 = arith.constant 1 : index
    %c2_50 = arith.constant 2 : index
    %85 = memref.load %arg4[%c1_49, %c2_50] : memref<4x4xf32, #tpu.memory_space<smem>>
    %86 = vector.broadcast %85 : f32 to vector<2x256xf32>
    %87 = arith.mulf %5, %86 : vector<2x256xf32>
    %88 = arith.addf %84, %87 : vector<2x256xf32>
    %c1_51 = arith.constant 1 : index
    %c3_52 = arith.constant 3 : index
    %89 = memref.load %arg4[%c1_51, %c3_52] : memref<4x4xf32, #tpu.memory_space<smem>>
    %90 = vector.broadcast %89 : f32 to vector<2x256xf32>
    %91 = arith.mulf %7, %90 : vector<2x256xf32>
    %92 = arith.addf %88, %91 : vector<2x256xf32>
    %c1_53 = arith.constant 1 : index
    %93 = memref.load %arg6[%c1_53] : memref<4xf32, #tpu.memory_space<smem>>
    %94 = vector.broadcast %93 : f32 to vector<2x256xf32>
    %95 = arith.addf %92, %94 : vector<2x256xf32>
    %cst_54 = arith.constant 2.000000e+01 : f32
    %96 = vector.broadcast %cst_54 : f32 to vector<2x256xf32>
    %97 = arith.cmpf ogt, %95, %96 : vector<2x256xf32>
    %98 = math.exp %95 : vector<2x256xf32>
    %99 = math.log1p %98 : vector<2x256xf32>
    %100 = arith.select %97, %95, %99 : vector<2x256xi1>, vector<2x256xf32>
    %cst_55 = arith.constant 9.99999997E-7 : f32
    %101 = vector.broadcast %cst_55 : f32 to vector<2x256xf32>
    %102 = arith.addf %100, %101 : vector<2x256xf32>
    %c1_56 = arith.constant 1 : index
    %c0_57 = arith.constant 0 : index
    %c0_58 = arith.constant 0 : index
    %103 = vector.load %arg8[%c1_56, %c0_57, %c0_58] : memref<4x2x256xf32, #tpu.memory_space<vmem>>, vector<1x2x256xf32>
    %104 = vector.shape_cast %103 : vector<1x2x256xf32> to vector<2x256xf32>
    %105 = vector.shape_cast %102 : vector<2x256xf32> to vector<1x2x256xf32>
    tpu.vector_store %arg8[%c1_56, %c0_57, %c0_58], %105 {strides = array<i32>} : memref<4x2x256xf32, #tpu.memory_space<vmem>>, vector<1x2x256xf32>,
    %c2_59 = arith.constant 2 : index
    %c0_60 = arith.constant 0 : index
    %106 = memref.load %arg3[%c2_59, %c0_60] : memref<4x4xf32, #tpu.memory_space<smem>>
    %107 = vector.broadcast %106 : f32 to vector<2x256xf32>
    %108 = arith.mulf %1, %107 : vector<2x256xf32>
    %c2_61 = arith.constant 2 : index
    %c1_62 = arith.constant 1 : index
    %109 = memref.load %arg3[%c2_61, %c1_62] : memref<4x4xf32, #tpu.memory_space<smem>>
    %110 = vector.broadcast %109 : f32 to vector<2x256xf32>
    %111 = arith.mulf %3, %110 : vector<2x256xf32>
    %112 = arith.addf %108, %111 : vector<2x256xf32>
    %c2_63 = arith.constant 2 : index
    %c2_64 = arith.constant 2 : index
    %113 = memref.load %arg3[%c2_63, %c2_64] : memref<4x4xf32, #tpu.memory_space<smem>>
    %114 = vector.broadcast %113 : f32 to vector<2x256xf32>
    %115 = arith.mulf %5, %114 : vector<2x256xf32>
    %116 = arith.addf %112, %115 : vector<2x256xf32>
    %c2_65 = arith.constant 2 : index
    %c3_66 = arith.constant 3 : index
    %117 = memref.load %arg3[%c2_65, %c3_66] : memref<4x4xf32, #tpu.memory_space<smem>>
    %118 = vector.broadcast %117 : f32 to vector<2x256xf32>
    %119 = arith.mulf %7, %118 : vector<2x256xf32>
    %120 = arith.addf %116, %119 : vector<2x256xf32>
    %c2_67 = arith.constant 2 : index
    %121 = memref.load %arg5[%c2_67] : memref<4xf32, #tpu.memory_space<smem>>
    %122 = vector.broadcast %121 : f32 to vector<2x256xf32>
    %123 = arith.addf %120, %122 : vector<2x256xf32>
    %c2_68 = arith.constant 2 : index
    %c0_69 = arith.constant 0 : index
    %c0_70 = arith.constant 0 : index
    %124 = vector.load %arg7[%c2_68, %c0_69, %c0_70] : memref<4x2x256xf32, #tpu.memory_space<vmem>>, vector<1x2x256xf32>
    %125 = vector.shape_cast %124 : vector<1x2x256xf32> to vector<2x256xf32>
    %126 = vector.shape_cast %123 : vector<2x256xf32> to vector<1x2x256xf32>
    tpu.vector_store %arg7[%c2_68, %c0_69, %c0_70], %126 {strides = array<i32>} : memref<4x2x256xf32, #tpu.memory_space<vmem>>, vector<1x2x256xf32>,
    %c2_71 = arith.constant 2 : index
    %c0_72 = arith.constant 0 : index
    %127 = memref.load %arg4[%c2_71, %c0_72] : memref<4x4xf32, #tpu.memory_space<smem>>
    %128 = vector.broadcast %127 : f32 to vector<2x256xf32>
    %129 = arith.mulf %1, %128 : vector<2x256xf32>
    %c2_73 = arith.constant 2 : index
    %c1_74 = arith.constant 1 : index
    %130 = memref.load %arg4[%c2_73, %c1_74] : memref<4x4xf32, #tpu.memory_space<smem>>
    %131 = vector.broadcast %130 : f32 to vector<2x256xf32>
    %132 = arith.mulf %3, %131 : vector<2x256xf32>
    %133 = arith.addf %129, %132 : vector<2x256xf32>
    %c2_75 = arith.constant 2 : index
    %c2_76 = arith.constant 2 : index
    %134 = memref.load %arg4[%c2_75, %c2_76] : memref<4x4xf32, #tpu.memory_space<smem>>
    %135 = vector.broadcast %134 : f32 to vector<2x256xf32>
    %136 = arith.mulf %5, %135 : vector<2x256xf32>
    %137 = arith.addf %133, %136 : vector<2x256xf32>
    %c2_77 = arith.constant 2 : index
    %c3_78 = arith.constant 3 : index
    %138 = memref.load %arg4[%c2_77, %c3_78] : memref<4x4xf32, #tpu.memory_space<smem>>
    %139 = vector.broadcast %138 : f32 to vector<2x256xf32>
    %140 = arith.mulf %7, %139 : vector<2x256xf32>
    %141 = arith.addf %137, %140 : vector<2x256xf32>
    %c2_79 = arith.constant 2 : index
    %142 = memref.load %arg6[%c2_79] : memref<4xf32, #tpu.memory_space<smem>>
    %143 = vector.broadcast %142 : f32 to vector<2x256xf32>
    %144 = arith.addf %141, %143 : vector<2x256xf32>
    %cst_80 = arith.constant 2.000000e+01 : f32
    %145 = vector.broadcast %cst_80 : f32 to vector<2x256xf32>
    %146 = arith.cmpf ogt, %144, %145 : vector<2x256xf32>
    %147 = math.exp %144 : vector<2x256xf32>
    %148 = math.log1p %147 : vector<2x256xf32>
    %149 = arith.select %146, %144, %148 : vector<2x256xi1>, vector<2x256xf32>
    %cst_81 = arith.constant 9.99999997E-7 : f32
    %150 = vector.broadcast %cst_81 : f32 to vector<2x256xf32>
    %151 = arith.addf %149, %150 : vector<2x256xf32>
    %c2_82 = arith.constant 2 : index
    %c0_83 = arith.constant 0 : index
    %c0_84 = arith.constant 0 : index
    %152 = vector.load %arg8[%c2_82, %c0_83, %c0_84] : memref<4x2x256xf32, #tpu.memory_space<vmem>>, vector<1x2x256xf32>
    %153 = vector.shape_cast %152 : vector<1x2x256xf32> to vector<2x256xf32>
    %154 = vector.shape_cast %151 : vector<2x256xf32> to vector<1x2x256xf32>
    tpu.vector_store %arg8[%c2_82, %c0_83, %c0_84], %154 {strides = array<i32>} : memref<4x2x256xf32, #tpu.memory_space<vmem>>, vector<1x2x256xf32>,
    %c3_85 = arith.constant 3 : index
    %c0_86 = arith.constant 0 : index
    %155 = memref.load %arg3[%c3_85, %c0_86] : memref<4x4xf32, #tpu.memory_space<smem>>
    %156 = vector.broadcast %155 : f32 to vector<2x256xf32>
    %157 = arith.mulf %1, %156 : vector<2x256xf32>
    %c3_87 = arith.constant 3 : index
    %c1_88 = arith.constant 1 : index
    %158 = memref.load %arg3[%c3_87, %c1_88] : memref<4x4xf32, #tpu.memory_space<smem>>
    %159 = vector.broadcast %158 : f32 to vector<2x256xf32>
    %160 = arith.mulf %3, %159 : vector<2x256xf32>
    %161 = arith.addf %157, %160 : vector<2x256xf32>
    %c3_89 = arith.constant 3 : index
    %c2_90 = arith.constant 2 : index
    %162 = memref.load %arg3[%c3_89, %c2_90] : memref<4x4xf32, #tpu.memory_space<smem>>
    %163 = vector.broadcast %162 : f32 to vector<2x256xf32>
    %164 = arith.mulf %5, %163 : vector<2x256xf32>
    %165 = arith.addf %161, %164 : vector<2x256xf32>
    %c3_91 = arith.constant 3 : index
    %c3_92 = arith.constant 3 : index
    %166 = memref.load %arg3[%c3_91, %c3_92] : memref<4x4xf32, #tpu.memory_space<smem>>
    %167 = vector.broadcast %166 : f32 to vector<2x256xf32>
    %168 = arith.mulf %7, %167 : vector<2x256xf32>
    %169 = arith.addf %165, %168 : vector<2x256xf32>
    %c3_93 = arith.constant 3 : index
    %170 = memref.load %arg5[%c3_93] : memref<4xf32, #tpu.memory_space<smem>>
    %171 = vector.broadcast %170 : f32 to vector<2x256xf32>
    %172 = arith.addf %169, %171 : vector<2x256xf32>
    %c3_94 = arith.constant 3 : index
    %c0_95 = arith.constant 0 : index
    %c0_96 = arith.constant 0 : index
    %173 = vector.load %arg7[%c3_94, %c0_95, %c0_96] : memref<4x2x256xf32, #tpu.memory_space<vmem>>, vector<1x2x256xf32>
    %174 = vector.shape_cast %173 : vector<1x2x256xf32> to vector<2x256xf32>
    %175 = vector.shape_cast %172 : vector<2x256xf32> to vector<1x2x256xf32>
    tpu.vector_store %arg7[%c3_94, %c0_95, %c0_96], %175 {strides = array<i32>} : memref<4x2x256xf32, #tpu.memory_space<vmem>>, vector<1x2x256xf32>,
    %c3_97 = arith.constant 3 : index
    %c0_98 = arith.constant 0 : index
    %176 = memref.load %arg4[%c3_97, %c0_98] : memref<4x4xf32, #tpu.memory_space<smem>>
    %177 = vector.broadcast %176 : f32 to vector<2x256xf32>
    %178 = arith.mulf %1, %177 : vector<2x256xf32>
    %c3_99 = arith.constant 3 : index
    %c1_100 = arith.constant 1 : index
    %179 = memref.load %arg4[%c3_99, %c1_100] : memref<4x4xf32, #tpu.memory_space<smem>>
    %180 = vector.broadcast %179 : f32 to vector<2x256xf32>
    %181 = arith.mulf %3, %180 : vector<2x256xf32>
    %182 = arith.addf %178, %181 : vector<2x256xf32>
    %c3_101 = arith.constant 3 : index
    %c2_102 = arith.constant 2 : index
    %183 = memref.load %arg4[%c3_101, %c2_102] : memref<4x4xf32, #tpu.memory_space<smem>>
    %184 = vector.broadcast %183 : f32 to vector<2x256xf32>
    %185 = arith.mulf %5, %184 : vector<2x256xf32>
    %186 = arith.addf %182, %185 : vector<2x256xf32>
    %c3_103 = arith.constant 3 : index
    %c3_104 = arith.constant 3 : index
    %187 = memref.load %arg4[%c3_103, %c3_104] : memref<4x4xf32, #tpu.memory_space<smem>>
    %188 = vector.broadcast %187 : f32 to vector<2x256xf32>
    %189 = arith.mulf %7, %188 : vector<2x256xf32>
    %190 = arith.addf %186, %189 : vector<2x256xf32>
    %c3_105 = arith.constant 3 : index
    %191 = memref.load %arg6[%c3_105] : memref<4xf32, #tpu.memory_space<smem>>
    %192 = vector.broadcast %191 : f32 to vector<2x256xf32>
    %193 = arith.addf %190, %192 : vector<2x256xf32>
    %cst_106 = arith.constant 2.000000e+01 : f32
    %194 = vector.broadcast %cst_106 : f32 to vector<2x256xf32>
    %195 = arith.cmpf ogt, %193, %194 : vector<2x256xf32>
    %196 = math.exp %193 : vector<2x256xf32>
    %197 = math.log1p %196 : vector<2x256xf32>
    %198 = arith.select %195, %193, %197 : vector<2x256xi1>, vector<2x256xf32>
    %cst_107 = arith.constant 9.99999997E-7 : f32
    %199 = vector.broadcast %cst_107 : f32 to vector<2x256xf32>
    %200 = arith.addf %198, %199 : vector<2x256xf32>
    %c3_108 = arith.constant 3 : index
    %c0_109 = arith.constant 0 : index
    %c0_110 = arith.constant 0 : index
    %201 = vector.load %arg8[%c3_108, %c0_109, %c0_110] : memref<4x2x256xf32, #tpu.memory_space<vmem>>, vector<1x2x256xf32>
    %202 = vector.shape_cast %201 : vector<1x2x256xf32> to vector<2x256xf32>
    %203 = vector.shape_cast %200 : vector<2x256xf32> to vector<1x2x256xf32>
    tpu.vector_store %arg8[%c3_108, %c0_109, %c0_110], %203 {strides = array<i32>} : memref<4x2x256xf32, #tpu.memory_space<vmem>>, vector<1x2x256xf32>,
    return
  }
  func.func @transform_0(%arg0: i32, %arg1: i32) -> (i32, i32, i32) {
    %c0_i32 = arith.constant 0 : i32
    %c0_i32_0 = arith.constant 0 : i32
    return %arg0, %c0_i32, %arg1 : i32, i32, i32
  }
  func.func @transform_1(%arg0: i32, %arg1: i32) -> (i32, i32) {
    %c0_i32 = arith.constant 0 : i32
    %c0_i32_0 = arith.constant 0 : i32
    %c0_i32_1 = arith.constant 0 : i32
    return %c0_i32, %c0_i32_0 : i32, i32
  }
  func.func @transform_2(%arg0: i32, %arg1: i32) -> (i32, i32) {
    %c0_i32 = arith.constant 0 : i32
    %c0_i32_0 = arith.constant 0 : i32
    %c0_i32_1 = arith.constant 0 : i32
    return %c0_i32, %c0_i32_0 : i32, i32
  }
  func.func @transform_3(%arg0: i32, %arg1: i32) -> i32 {
    %c0_i32 = arith.constant 0 : i32
    %c0_i32_0 = arith.constant 0 : i32
    return %c0_i32 : i32
  }
  func.func @transform_4(%arg0: i32, %arg1: i32) -> i32 {
    %c0_i32 = arith.constant 0 : i32
    %c0_i32_0 = arith.constant 0 : i32
    return %c0_i32 : i32
  }
  func.func @transform_5(%arg0: i32, %arg1: i32) -> (i32, i32, i32) {
    %c0_i32 = arith.constant 0 : i32
    %c0_i32_0 = arith.constant 0 : i32
    return %c0_i32, %arg0, %arg1 : i32, i32, i32
  }
  func.func @transform_6(%arg0: i32, %arg1: i32) -> (i32, i32, i32) {
    %c0_i32 = arith.constant 0 : i32
    %c0_i32_0 = arith.constant 0 : i32
    return %c0_i32, %arg0, %arg1 : i32, i32, i32
  }
}

</mosaic_0001>

<bundles_post_ra>
// kernel: gaussian_ensemble_forward.1
= control target key start
LH: loop header
LB: loop body
LE: loop exit
PB: predicated region body
PF: predicated region fallthrough
CT: control target
= control target key end

     0   :  { %12 = vsyncpa [#allocation3], 0  ;;  %s1018_s0 = inlined_call_operand.vmem [shape: f32[2,4,256], index: 0, kind: input, shape index: {}]   ;;  %s1019_s1 = inlined_call_operand.vmem [shape: f32[4,4], index: 1, kind: input, shape index: {}]   ;;  %s1020_s2 = inlined_call_operand.vmem [shape: f32[4,4], index: 2, kind: input, shape index: {}]   ;;  %s1021_s3 = inlined_call_operand.vmem [shape: f32[4], index: 3, kind: input, shape index: {}]   ;;  %s1022_s4 = inlined_call_operand.vmem [shape: f32[4], index: 4, kind: input, shape index: {}]   ;;  %s1023_s5 = inlined_call_operand.vmem [shape: f32[4,2,256], index: 5, kind: output, shape index: {0}]   ;;  %s1024_s6 = inlined_call_operand.vmem [shape: f32[4,2,256], index: 6, kind: output, shape index: {1}]  }
   0x1   :  { %13 = vsyncpa [#allocation5], 0  ;;  %s33_s23 = sshll.u32 %s1020_s2, 4  ;;  %s34_s23 = int_to_ptr.vmem [resolvable:$true] %s33_s23 }
   0x2   :  { %14 = vsyncpa [#allocation8], 0  ;;  %s23_s26 = sshll.u32 %s1019_s1, 4  ;;  %s611_s27 = scalar_lea.vmem %s34_s23, 64  ;;  %s24_s26 = int_to_ptr.vmem [resolvable:$true] %s23_s26 }
   0x3   :  { %p612_p0 = scmp.ne.s32.totalorder %s34_s23, %s611_s27  ;;  %p616_p1 = scmp.lt.s32.totalorder %s34_s23, %s34_s23 }
   0x4   :  { %p617_p2 = scmp.lt.s32.totalorder %s611_s27, %s611_s27 }
   0x6   :  { %p618_p3 = por %p617_p2, %p616_p1 }
   0x8   :  { %p619_p4 = pnand %p618_p3, %p612_p0 }
   0xa   :  { %622 = shalt.err (!%p619_p4)
}
   0xb   :  { %s665_s28 = smov [#allocation4]   ;;  %s623_s29 = scalar_lea.vmem %s24_s26, 64 }
   0xc   :  { %36 = dma.vmem_to_smem %s34_s23, 64, %s665_s28, [#allocation5]  }
   0xd   :  { %p624_p5 = scmp.ne.s32.totalorder %s24_s26, %s623_s29  ;;  %p628_p6 = scmp.lt.s32.totalorder %s24_s26, %s24_s26 }
   0xe   :  { %p629_p7 = scmp.lt.s32.totalorder %s623_s29, %s623_s29 }
  0x10   :  { %p630_p8 = por %p629_p7, %p628_p6 }
  0x12   :  { %p631_p9 = pnand %p630_p8, %p624_p5 }
  0x14   :  { %634 = shalt.err (!%p631_p9)
}
  0x15   :  { %s666_s2 = smov [#allocation2]   ;;  %s43_s7 = sshll.u32 %s1021_s3, 4  ;;  %s44_s7 = int_to_ptr.vmem [resolvable:$true] %s43_s7 }
  0x16   :  { %26 = dma.vmem_to_smem %s24_s26, 64, %s666_s2, [#allocation3]  }
  0x17   :  { %s53_s10 = sshll.u32 %s1022_s4, 4  ;;  %s635_s11 = scalar_lea.vmem %s44_s7, 16  ;;  %s54_s10 = int_to_ptr.vmem [resolvable:$true] %s53_s10 }
  0x18   :  { %p636_p10 = scmp.ne.s32.totalorder %s44_s7, %s635_s11  ;;  %p640_p11 = scmp.lt.s32.totalorder %s44_s7, %s44_s7 }
  0x19   :  { %p641_p12 = scmp.lt.s32.totalorder %s635_s11, %s635_s11 }
  0x1b   :  { %p642_p13 = por %p641_p12, %p640_p11 }
  0x1d   :  { %p643_p0 = pnand %p642_p13, %p636_p10 }
  0x1f   :  { %646 = shalt.err (!%p643_p0)
}
  0x20   :  { %s667_s12 = smov [#allocation6]   ;;  %s647_s13 = scalar_lea.vmem %s54_s10, 16 }
  0x21   :  { %46 = dma.vmem_to_smem %s44_s7, 16, %s667_s12, [#allocation5]  }
  0x22   :  { %p648_p1 = scmp.ne.s32.totalorder %s54_s10, %s647_s13  ;;  %p652_p2 = scmp.lt.s32.totalorder %s54_s10, %s54_s10 }
  0x23   :  { %p653_p3 = scmp.lt.s32.totalorder %s647_s13, %s647_s13 }
  0x25   :  { %p654_p4 = por %p653_p3, %p652_p2 }
  0x27   :  { %p655_p5 = pnand %p654_p4, %p648_p1 }
  0x29   :  { %658 = shalt.err (!%p655_p5)
}
  0x2a   :  { %s668_s3 = smov [#allocation7]  }
  0x2b   :  { %56 = dma.vmem_to_smem %s54_s10, 16, %s668_s3, [#allocation8]  }
  0x2c   :  { %659 = dma.done.wait [#allocation3], 64  }
  0x2d   :  { %660 = vsyncadd [#allocation3], 4294967232 }
  0x2e   :  { %661 = dma.done.wait [#allocation5], 80  }
  0x2f   :  { %662 = vsyncadd [#allocation5], 4294967216 }
  0x30   :  { %663 = dma.done.wait [#allocation8], 16  }
  0x31   :  { %664 = vsyncadd [#allocation8], 4294967280 }
  0x32   :  { %69 = sfence }
  0x33   :  { %s85_s4 = sld [smem:[#allocation2]]  ;;  %s525_s14 = sld [smem:[#allocation2 + $0x1]]  ;;  %v731_v0 = vld [vmem:[%s1018_s0] ss:$4 sm:$0x3] }
  0x34   :  { %s716_s15 = sld [smem:[#allocation2 + $0x2]]  ;;  %s718_s16 = sld [smem:[#allocation2 + $0x3]]  ;;  %v736_v1 = vld [vmem:[%s1018_s0 + $0x8] ss:$4 sm:$0x3] }
  0x35   :  { %s720_s17 = sld [smem:[#allocation6]]  ;;  %s724_s19 = sld [smem:[#allocation4 + $0x1]]  ;;  %v741_v2 = vld [vmem:[%s1018_s0 + $0x1] ss:$4 sm:$0x3] }
  0x36   :  { %s722_s18 = sld [smem:[#allocation4]]  ;;  %s726_s20 = sld [smem:[#allocation4 + $0x2]]  ;;  %v746_v3 = vld [vmem:[%s1018_s0 + $0x9] ss:$4 sm:$0x3] }
  0x37   :  { %s748_s29 = sld [smem:[#allocation4 + $0x3]]  ;;  %s750_s2 = sld [smem:[#allocation7]]  ;;  %v755_v4 = vld [vmem:[%s1018_s0 + $0x2] ss:$4 sm:$0x3] }
  0x38   :  { %v760_v5 = vld [vmem:[%s1018_s0 + $0xa] ss:$4 sm:$0x3]  ;;  %v765_v8 = vld [vmem:[%s1018_s0 + $0x3] ss:$4 sm:$0x3] }
  0x39   :  { %v86_v6 = vstv %s85_s4  ;;  %v90_v7 = vstv %s525_s14  ;;  %s771_s11 = sld [smem:[#allocation2 + $0x80]]  ;;  %s773_s12 = sld [smem:[#allocation2 + $0x81]]  ;;  %v782_v17 = vld [vmem:[%s1018_s0 + $0xb] ss:$4 sm:$0x3] }
  0x3a   :  { %v87_v9 = vmul.f32 %v86_v6, %v731_v0  ;;  %v88_v10 = vmul.f32 %v736_v1, %v86_v6  ;;  %v91_v11 = vmul.f32 %v741_v2, %v90_v7  ;;  %v92_v12 = vmul.f32 %v746_v3, %v90_v7  ;;  %s786_s4 = sld [smem:[#allocation2 + $0x82]]  ;;  %s794_s0 = sld [smem:[#allocation2 + $0x83]] }
  0x3b   :  { %v96_v13 = vstv %s716_s15  ;;  %v102_v14 = vstv %s718_s16  ;;  %v108_v15 = vstv %s720_s17  ;;  %v128_v28 = vstv %s724_s19  ;;  %s802_s14 = sld [smem:[#allocation4 + $0x80]]  ;;  %s804_s15 = sld [smem:[#allocation4 + $0x81]] }
  0x3c   :  { %v124_v16 = vstv %s722_s18  ;;  %v93_v18 = vadd.f32 %v91_v11, %v87_v9  ;;  %v94_v19 = vadd.f32 %v92_v12, %v88_v10  ;;  %v97_v20 = vmul.f32 %v755_v4, %v96_v13  ;;  %s808_s16 = sld [smem:[#allocation6 + $0x1]]  ;;  %s814_s17 = sld [smem:[#allocation4 + $0x82]] }
  0x3d   :  { %v98_v21 = vmul.f32 %v760_v5, %v96_v13  ;;  %v103_v22 = vmul.f32 %v765_v8, %v102_v14  ;;  %v104_v23 = vmul.f32 %v782_v17, %v102_v14  ;;  %v125_v24 = vmul.f32 %v124_v16, %v731_v0  ;;  %s821_s18 = sld [smem:[#allocation4 + $0x83]]  ;;  %s827_s21 = sld [smem:[#allocation7 + $0x1]] }
  0x3e   :  { %v126_v25 = vmul.f32 %v736_v1, %v124_v16  ;;  %v99_v26 = vadd.f32 %v97_v20, %v93_v18  ;;  %v134_v29 = vstv %s726_s20  ;;  %v129_v30 = vmul.f32 %v741_v2, %v128_v28  ;;  %s835_s22 = sld [smem:[#allocation2 + $0x100]]  ;;  %s837_s23 = sld [smem:[#allocation2 + $0x101]] }
  0x3f   :  { %v100_v27 = vadd.f32 %v98_v21, %v94_v19  ;;  %v130_v31 = vmul.f32 %v746_v3, %v128_v28  ;;  %v135_v32 = vmul.f32 %v755_v4, %v134_v29  ;;  %v136_v33 = vmul.f32 %v760_v5, %v134_v29  ;;  %s841_s24 = sld [smem:[#allocation2 + $0x102]]  ;;  %s846_s25 = sld [smem:[#allocation2 + $0x103]] }
  0x40   :  { %v105_v34 = vadd.f32 %v103_v22, %v99_v26  ;;  %v140_v36 = vstv %s748_s29  ;;  %v146_v37 = vstv %s750_s2  ;;  %v131_v38 = vadd.f32 %v129_v30, %v125_v24  ;;  %s856_s26 = sld [smem:[#allocation6 + $0x2]]  ;;  %s863_s27 = sld [smem:[#allocation4 + $0x100]] }
  0x41   :  { %v106_v35 = vadd.f32 %v104_v23, %v100_v27  ;;  %v132_v39 = vadd.f32 %v130_v31, %v126_v25  ;;  %v141_v40 = vmul.f32 %v765_v8, %v140_v36  ;;  %v142_v41 = vmul.f32 %v782_v17, %v140_v36  ;;  %s881_s2 = sld [smem:[#allocation4 + $0x101]]  ;;  %s883_s1 = sld [smem:[#allocation4 + $0x102]] }
  0x42   :  { %v109_v42 = vadd.f32 %v108_v15, %v105_v34  ;;  %v190_v44 = vstv %s771_s11  ;;  %v194_v45 = vstv %s773_s12  ;;  %v137_v46 = vadd.f32 %v135_v32, %v131_v38  ;;  %s888_s30 = sld [smem:[#allocation4 + $0x103]]  ;;  %s890_s7 = sld [smem:[#allocation2 + $0x180]] }
  0x43   :  { %v110_v43 = vadd.f32 %v108_v15, %v106_v35  ;;  %v138_v47 = vadd.f32 %v136_v33, %v132_v39  ;;  %v191_v48 = vmul.f32 %v190_v44, %v731_v0  ;;  %v192_v49 = vmul.f32 %v736_v1, %v190_v44  ;;  %s893_s8 = sld [smem:[#allocation2 + $0x181]]  ;;  %s896_s9 = sld [smem:[#allocation2 + $0x182]] }
  0x44   :  { %v195_v51 = vmul.f32 %v741_v2, %v194_v45  ;;  %v196_v52 = vmul.f32 %v746_v3, %v194_v45  ;;  %v200_v53 = vstv %s786_s4  ;;  %v143_v54 = vadd.f32 %v141_v40, %v137_v46  ;;  %s898_s10 = sld [smem:[#allocation7 + $0x2]]  ;;  %s909_s11 = sld [smem:[#allocation2 + $0x183]] }
  0x45   :  { %v113_v50 = vcombine.low %v109_v42, %v110_v43  ;;  %v144_v55 = vadd.f32 %v142_v41, %v138_v47  ;;  %v201_v56 = vmul.f32 %v755_v4, %v200_v53  ;;  %v202_v57 = vmul.f32 %v760_v5, %v200_v53  ;;  %s929_s3 = sld [smem:[#allocation6 + $0x3]]  ;;  %s937_s4 = sld [smem:[#allocation4 + $0x180]] }
  0x46   :  { %v197_v58 = vadd.f32 %v195_v51, %v191_v48  ;;  %v198_v59 = vadd.f32 %v196_v52, %v192_v49  ;;  %v206_v60 = vstv %s794_s0  ;;  %v829_v61 = vadd.f32 %v146_v37, %v143_v54  ;;  %s941_s0 = sld [smem:[#allocation4 + $0x181]] }
  0x47   :  { %528 = vst.sshfl [vmem:[%s1023_s5] sm:$0x33 pattern:$0x75316420] %v113_v50  ;;  %v831_v62 = vadd.f32 %v146_v37, %v144_v55  ;;  %v207_v63 = vmul.f32 %v765_v8, %v206_v60  ;;  %v208_v6 = vmul.f32 %v782_v17, %v206_v60  ;;  %v229_v10 = vstv %s802_s14  ;;  %s945_s14 = sld [smem:[#allocation4 + $0x182]] }
  0x48   :  { %v203_v7 = vadd.f32 %v201_v56, %v197_v58  ;;  %v204_v9 = vadd.f32 %v202_v57, %v198_v59  ;;  %v233_v11 = vstv %s804_s15  ;;  %v151_v12 = vmul.f32 1.442695, %v829_v61  ;;  %s954_s15 = sld [smem:[#allocation4 + $0x183]] }
  0x49   :  { %v153_v13 = vmul.f32 1.442695, %v831_v62  ;;  %v212_v14 = vstv %s808_s16  ;;  %v230_v18 = vmul.f32 %v229_v10, %v731_v0  ;;  %v231_v19 = vmul.f32 %v736_v1, %v229_v10  ;;  %s973_s16 = sld [smem:[#allocation7 + $0x3]] }
  0x4a   :  { %v209_v15 = vadd.f32 %v207_v63, %v203_v7  ;;  %v210_v16 = vadd.f32 %v208_v6, %v204_v9  ;;  %579 = vpow2.f32 %v151_v12  ;;  %v234_v20 = vmul.f32 %v741_v2, %v233_v11 }
  0x4b   :  { %v235_v21 = vmul.f32 %v746_v3, %v233_v11  ;;  %v239_v22 = vstv %s814_s17  ;;  %581 = vpow2.f32 %v153_v13  ;;  %v245_v29 = vstv %s821_s18 }
  0x4c   :  { %v213_v23 = vadd.f32 %v212_v14, %v209_v15  ;;  %v214_v24 = vadd.f32 %v212_v14, %v210_v16  ;;  %v240_v25 = vmul.f32 %v755_v4, %v239_v22  ;;  %v236_v26 = vadd.f32 %v234_v20, %v230_v18 }
  0x4d   :  { %v237_v27 = vadd.f32 %v235_v21, %v231_v19  ;;  %v241_v28 = vmul.f32 %v760_v5, %v239_v22  ;;  %v246_v31 = vmul.f32 %v765_v8, %v245_v29  ;;  %v247_v32 = vmul.f32 %v782_v17, %v245_v29 }
  0x4e   :  { %v217_v30 = vcombine.low %v213_v23, %v214_v24  ;;  %v251_v33 = vstv %s827_s21  ;;  %v242_v34 = vadd.f32 %v240_v25, %v236_v26  ;;  %v296_v36 = vstv %s835_s22 }
  0x4f   :  { %v243_v35 = vadd.f32 %v241_v28, %v237_v27  ;;  %v300_v37 = vstv %s837_s23  ;;  %v297_v38 = vmul.f32 %v296_v36, %v731_v0  ;;  %v298_v39 = vmul.f32 %v736_v1, %v296_v36 }
  0x50   :  { %569 = vst.sshfl [vmem:[%s1023_s5 + $0x4] sm:$0x33 pattern:$0x75316420] %v217_v30  ;;  %v301_v40 = vmul.f32 %v741_v2, %v300_v37  ;;  %v302_v41 = vmul.f32 %v746_v3, %v300_v37  ;;  %v248_v42 = vadd.f32 %v246_v31, %v242_v34  ;;  %v306_v44 = vstv %s841_s24 }
  0x51   :  { %v249_v43 = vadd.f32 %v247_v32, %v243_v35  ;;  %v312_v45 = vstv %s846_s25  ;;  %v307_v48 = vmul.f32 %v755_v4, %v306_v44  ;;  %v308_v49 = vmul.f32 %v760_v5, %v306_v44 }
  0x52   :  { %v303_v46 = vadd.f32 %v301_v40, %v297_v38  ;;  %v304_v47 = vadd.f32 %v302_v41, %v298_v39  ;;  %v876_v50 = vadd.f32 %v251_v33, %v248_v42  ;;  %v313_v52 = vmul.f32 %v765_v8, %v312_v45 }
  0x53   :  { %v878_v51 = vadd.f32 %v251_v33, %v249_v43  ;;  %v314_v55 = vmul.f32 %v782_v17, %v312_v45  ;;  %v318_v58 = vstv %s856_s26  ;;  %v335_v11 = vstv %s863_s27 }
  0x54   :  { %v309_v53 = vadd.f32 %v307_v48, %v303_v46  ;;  %v310_v54 = vadd.f32 %v308_v49, %v304_v47  ;;  %v580_v56 = vpop.eup %579  ;;  %v256_v57 = vmul.f32 1.442695, %v876_v50  ;;  %v336_v19 = vmul.f32 %v335_v11, %v731_v0 }
  0x55   :  { %v582_v59 = vpop.eup %581  ;;  %v155_v60 = vadd.f32 1.0, %v580_v56  ;;  %v158_v63 = vmul.f32 -0.5, %v580_v56  ;;  %v258_v6 = vmul.f32 1.442695, %v878_v51  ;;  %v161_v9 = vand.u32 2147483647, %v580_v56 }
  0x56   :  { %v315_v7 = vadd.f32 %v313_v52, %v309_v53  ;;  %v164_v10 = vadd.f32 1.0, %v582_v59  ;;  %583 = vpow2.f32 %v256_v57  ;;  %v316_v12 = vadd.f32 %v314_v55, %v310_v54 }
  0x57   :  { %585 = vlog2.f32 %v155_v60  ;;  %v167_v13 = vmul.f32 -0.5, %v582_v59  ;;  %v170_v14 = vand.u32 2147483647, %v582_v59  ;;  %v159_v16 = vadd.f32 1.0, %v158_v63 }
  0x58   :  { %587 = vlog2.f32 %v164_v10  ;;  %v319_v15 = vadd.f32 %v318_v58, %v315_v7  ;;  %v320_v18 = vadd.f32 %v318_v58, %v316_v12  ;;  %vm149_vm0 = vcmp.gt.f32.partialorder %v829_v61, 20.0 }
  0x59   :  { %589 = vpow2.f32 %v258_v6  ;;  %vm902_vm1 = vcmp.lt.f32.partialorder %v161_v9, 0.0004427343  ;;  %v337_v21 = vmul.f32 %v736_v1, %v335_v11  ;;  %v339_v22 = vstv %s881_s2 }
  0x5a   :  { %v345_v23 = vstv %s883_s1  ;;  %vm150_vm2 = vcmp.gt.f32.partialorder %v831_v62, 20.0  ;;  %v323_v24 = vcombine.low %v319_v15, %v320_v18  ;;  %v340_v25 = vmul.f32 %v741_v2, %v339_v22 }
  0x5b   :  { %v341_v26 = vmul.f32 %v746_v3, %v339_v22  ;;  %v346_v27 = vmul.f32 %v755_v4, %v345_v23  ;;  %v168_v28 = vadd.f32 1.0, %v167_v13  ;;  %v347_v29 = vmul.f32 %v760_v5, %v345_v23 }
  0x5c   :  { %v351_v30 = vstv %s888_s30  ;;  %v402_v31 = vstv %s890_s7  ;;  %vm918_vm3 = vcmp.lt.f32.partialorder %v170_v14, 0.0004427343  ;;  %571 = vst.sshfl [vmem:[%s1023_s5 + $0x8] sm:$0x33 pattern:$0x75316420] %v323_v24  ;;  %v342_v33 = vadd.f32 %v340_v25, %v336_v19 }
  0x5d   :  { %v343_v34 = vadd.f32 %v341_v26, %v337_v21  ;;  %v352_v35 = vmul.f32 %v765_v8, %v351_v30  ;;  %v160_v36 = vmul.f32 %v580_v56, %v159_v16  ;;  %v353_v37 = vmul.f32 %v782_v17, %v351_v30 }
  0x5e   :  { %v406_v38 = vstv %s893_s8  ;;  %v412_v39 = vstv %s896_s9  ;;  %v348_v40 = vadd.f32 %v346_v27, %v342_v33  ;;  %v403_v42 = vmul.f32 %v402_v31, %v731_v0 }
  0x5f   :  { %v349_v41 = vadd.f32 %v347_v29, %v343_v34  ;;  %v407_v43 = vmul.f32 %v741_v2, %v406_v38  ;;  %v169_v45 = vmul.f32 %v582_v59, %v168_v28  ;;  %v357_v46 = vstv %s898_s10 }
  0x60   :  { %v584_v44 = vpop.eup %583  ;;  %v404_v47 = vmul.f32 %v736_v1, %v402_v31  ;;  %v408_v48 = vmul.f32 %v746_v3, %v406_v38  ;;  %v354_v54 = vadd.f32 %v352_v35, %v348_v40  ;;  %v413_v55 = vmul.f32 %v755_v4, %v412_v39 }
  0x61   :  { %v586_v49 = vpop.eup %585  ;;  %v260_v52 = vadd.f32 1.0, %v584_v44  ;;  %v263_v53 = vmul.f32 -0.5, %v584_v44  ;;  %v266_v58 = vand.u32 2147483647, %v584_v44  ;;  %v414_v60 = vmul.f32 %v760_v5, %v412_v39 }
  0x62   :  { %v588_v56 = vpop.eup %587  ;;  %v157_v57 = vmul.f32 0.6931472, %v586_v49  ;;  %v418_v63 = vstv %s909_s11  ;;  %v355_v7 = vadd.f32 %v353_v37, %v349_v41  ;;  %v409_v9 = vadd.f32 %v407_v43, %v403_v42 }
  0x63   :  { %v590_v59 = vpop.eup %589  ;;  %v166_v6 = vmul.f32 0.6931472, %v588_v56  ;;  %591 = vlog2.f32 %v260_v52  ;;  %v264_v11 = vadd.f32 1.0, %v263_v53  ;;  %v410_v13 = vadd.f32 %v408_v48, %v404_v47 }
  0x64   :  { %v163_v10 = vsel %vm902_vm1, %v160_v36, %v157_v57  ;;  %v269_v12 = vadd.f32 1.0, %v590_v59  ;;  %v272_v16 = vmul.f32 -0.5, %v590_v59  ;;  %v952_v18 = vadd.f32 %v357_v46, %v354_v54 }
  0x65   :  { %v172_v14 = vsel %vm918_vm3, %v169_v45, %v166_v6  ;;  %v173_v15 = vsel %vm149_vm0, %v829_v61, %v163_v10  ;;  %vm254_vm4 = vcmp.gt.f32.partialorder %v876_v50, 20.0  ;;  %v424_v21 = vstv %s929_s3 }
  0x66   :  { %v174_v19 = vsel %vm150_vm2, %v831_v62, %v172_v14  ;;  %v175_v20 = vadd.f32 1e-06, %v173_v15  ;;  %593 = vlog2.f32 %v269_v12  ;;  %vm961_vm5 = vcmp.lt.f32.partialorder %v266_v58, 0.0004427343 }
  0x67   :  { %v176_v22 = vadd.f32 1e-06, %v174_v19  ;;  %v275_v61 = vand.u32 2147483647, %v590_v59  ;;  %v965_v24 = vadd.f32 %v357_v46, %v355_v7  ;;  %v265_v25 = vmul.f32 %v584_v44, %v264_v11 }
  0x68   :  { %v362_v26 = vmul.f32 1.442695, %v952_v18  ;;  %v415_v27 = vadd.f32 %v413_v55, %v409_v9  ;;  %v416_v62 = vadd.f32 %v414_v60, %v410_v13  ;;  %v273_v29 = vadd.f32 1.0, %v272_v16 }
  0x69   :  { %v179_v28 = vcombine.low %v175_v20, %v176_v22  ;;  %v364_v30 = vmul.f32 1.442695, %v965_v24  ;;  %v419_v31 = vmul.f32 %v765_v8, %v418_v63  ;;  %v420_v32 = vmul.f32 %v782_v17, %v418_v63 }
  0x6a   :  { %595 = vpow2.f32 %v362_v26  ;;  %v441_v33 = vstv %s937_s4  ;;  %v445_v34 = vstv %s941_s0  ;;  %v451_v41 = vstv %s945_s14 }
  0x6b   :  { %532 = vst.sshfl [vmem:[%s1024_s6] sm:$0x33 pattern:$0x75316420] %v179_v28  ;;  %597 = vpow2.f32 %v364_v30  ;;  %v421_v35 = vadd.f32 %v419_v31, %v415_v27  ;;  %v442_v36 = vmul.f32 %v441_v33, %v731_v0  ;;  %v443_v37 = vmul.f32 %v736_v1, %v441_v33 }
  0x6c   :  { %v422_v38 = vadd.f32 %v420_v32, %v416_v62  ;;  %v446_v39 = vmul.f32 %v741_v2, %v445_v34  ;;  %v447_v40 = vmul.f32 %v746_v3, %v445_v34  ;;  %v452_v44 = vmul.f32 %v755_v4, %v451_v41 }
  0x6d   :  { %v592_v42 = vpop.eup %591  ;;  %v425_v43 = vadd.f32 %v424_v21, %v421_v35  ;;  %v453_v45 = vmul.f32 %v760_v5, %v451_v41  ;;  %v457_v46 = vstv %s954_s15  ;;  %v274_v0 = vmul.f32 %v590_v59, %v273_v29 }
  0x6e   :  { %v262_v47 = vmul.f32 0.6931472, %v592_v42  ;;  %v426_v48 = vadd.f32 %v424_v21, %v422_v38  ;;  %v448_v49 = vadd.f32 %v446_v39, %v442_v36  ;;  %v449_v52 = vadd.f32 %v447_v40, %v443_v37 }
  0x6f   :  { %vm986_vm6 = vcmp.lt.f32.partialorder %v275_v61, 0.0004427343  ;;  %v458_v2 = vmul.f32 %v765_v8, %v457_v46  ;;  %v459_v3 = vmul.f32 %v782_v17, %v457_v46  ;;  %vm255_vm7 = vcmp.gt.f32.partialorder %v878_v51, 20.0 }
  0x70   :  { %v594_v53 = vpop.eup %593  ;;  %v268_v4 = vsel %vm961_vm5, %v265_v25, %v262_v47  ;;  %v429_v5 = vcombine.low %v425_v43, %v426_v48  ;;  %v454_v54 = vadd.f32 %v452_v44, %v448_v49  ;;  %v455_v55 = vadd.f32 %v453_v45, %v449_v52 }
  0x71   :  { %v271_v56 = vmul.f32 0.6931472, %v594_v53  ;;  %v278_v57 = vsel %vm254_vm4, %v876_v50, %v268_v4  ;;  %v463_v58 = vstv %s973_s16  ;;  %vm360_vm9 = vcmp.gt.f32.partialorder %v952_v18, 20.0 }
  0x72   :  { %573 = vst.sshfl [vmem:[%s1023_s5 + $0xc] sm:$0x33 pattern:$0x75316420] %v429_v5  ;;  %v460_v8 = vadd.f32 %v458_v2, %v454_v54  ;;  %v461_v17 = vadd.f32 %v459_v3, %v455_v55  ;;  %v280_v63 = vadd.f32 1e-06, %v278_v57 }
  0x73   :  { %v277_v60 = vsel %vm986_vm6, %v274_v0, %v271_v56  ;;  %vm361_vm11 = vcmp.gt.f32.partialorder %v965_v24, 20.0 }
  0x74   :  { %v596_v59 = vpop.eup %595  ;;  %v279_v6 = vsel %vm255_vm7, %v878_v51, %v277_v60  ;;  %v464_v11 = vadd.f32 %v463_v58, %v460_v8  ;;  %v465_v12 = vadd.f32 %v463_v58, %v461_v17 }
  0x75   :  { %v598_v7 = vpop.eup %597  ;;  %v281_v9 = vadd.f32 1e-06, %v279_v6  ;;  %v366_v10 = vadd.f32 1.0, %v596_v59  ;;  %v369_v14 = vmul.f32 -0.5, %v596_v59  ;;  %v372_v51 = vand.u32 2147483647, %v596_v59 }
  0x76   :  { %v375_v50 = vadd.f32 1.0, %v598_v7  ;;  %v378_v15 = vmul.f32 -0.5, %v598_v7  ;;  %v468_v16 = vmul.f32 1.442695, %v464_v11  ;;  %v470_v19 = vmul.f32 1.442695, %v465_v12 }
  0x77   :  { %v284_v13 = vcombine.low %v280_v63, %v281_v9  ;;  %599 = vlog2.f32 %v366_v10  ;;  %v370_v20 = vadd.f32 1.0, %v369_v14  ;;  %v381_v22 = vand.u32 2147483647, %v598_v7 }
  0x78   :  { %601 = vlog2.f32 %v375_v50  ;;  %v379_v21 = vadd.f32 1.0, %v378_v15  ;;  %vm373_vm8 = vcmp.lt.f32.partialorder %v372_v51, 0.0004427343  ;;  %vm466_vm13 = vcmp.gt.f32.partialorder %v464_v11, 20.0 }
  0x79   :  { %570 = vst.sshfl [vmem:[%s1024_s6 + $0x4] sm:$0x33 pattern:$0x75316420] %v284_v13  ;;  %603 = vpow2.f32 %v468_v16  ;;  %v371_v23 = vmul.f32 %v596_v59, %v370_v20  ;;  %vm382_vm10 = vcmp.lt.f32.partialorder %v381_v22, 0.0004427343 }
  0x7a   :  { %605 = vpow2.f32 %v470_v19  ;;  %v380_v25 = vmul.f32 %v598_v7, %v379_v21  ;;  %vm467_vm15 = vcmp.gt.f32.partialorder %v465_v12, 20.0 }
  0x81   :  { %v600_v61 = vpop.eup %599 }
  0x82   :  { %v602_v26 = vpop.eup %601  ;;  %v368_v27 = vmul.f32 0.6931472, %v600_v61 }
  0x83   :  { %v377_v62 = vmul.f32 0.6931472, %v602_v26  ;;  %v604_v29 = vpop.eup %603 }
  0x84   :  { %v374_v28 = vsel %vm373_vm8, %v371_v23, %v368_v27  ;;  %v606_v32 = vpop.eup %605  ;;  %v472_v35 = vadd.f32 1.0, %v604_v29  ;;  %v475_v39 = vmul.f32 -0.5, %v604_v29  ;;  %v478_v42 = vand.u32 2147483647, %v604_v29 }
  0x85   :  { %v383_v30 = vsel %vm382_vm10, %v380_v25, %v377_v62  ;;  %v384_v31 = vsel %vm360_vm9, %v952_v18, %v374_v28  ;;  %v481_v37 = vadd.f32 1.0, %v606_v32  ;;  %v484_v40 = vmul.f32 -0.5, %v606_v32 }
  0x86   :  { %v385_v33 = vsel %vm361_vm11, %v965_v24, %v383_v30  ;;  %v386_v34 = vadd.f32 1e-06, %v384_v31  ;;  %607 = vlog2.f32 %v472_v35  ;;  %v476_v41 = vadd.f32 1.0, %v475_v39 }
  0x87   :  { %v387_v36 = vadd.f32 1e-06, %v385_v33  ;;  %609 = vlog2.f32 %v481_v37  ;;  %v485_v43 = vadd.f32 1.0, %v484_v40  ;;  %v487_v18 = vand.u32 2147483647, %v606_v32 }
  0x88   :  { %v477_v44 = vmul.f32 %v604_v29, %v476_v41  ;;  %vm479_vm12 = vcmp.lt.f32.partialorder %v478_v42, 0.0004427343 }
  0x89   :  { %v390_v38 = vcombine.low %v386_v34, %v387_v36  ;;  %v486_v24 = vmul.f32 %v606_v32, %v485_v43  ;;  %vm488_vm14 = vcmp.lt.f32.partialorder %v487_v18, 0.0004427343 }
  0x8b   :  { %572 = vst.sshfl [vmem:[%s1024_s6 + $0x8] sm:$0x33 pattern:$0x75316420] %v390_v38 }
  0x90   :  { %v608_v45 = vpop.eup %607 }
  0x91   :  { %v610_v46 = vpop.eup %609  ;;  %v474_v47 = vmul.f32 0.6931472, %v608_v45 }
  0x92   :  { %v483_v48 = vmul.f32 0.6931472, %v610_v46 }
  0x93   :  { %v480_v49 = vsel %vm479_vm12, %v477_v44, %v474_v47 }
  0x94   :  { %v489_v52 = vsel %vm488_vm14, %v486_v24, %v483_v48  ;;  %v490_v0 = vsel %vm466_vm13, %v464_v11, %v480_v49 }
  0x95   :  { %v491_v1 = vsel %vm467_vm15, %v465_v12, %v489_v52  ;;  %v492_v2 = vadd.f32 1e-06, %v490_v0 }
  0x96   :  { %v493_v3 = vadd.f32 1e-06, %v491_v1 }
  0x98   :  { %v496_v53 = vcombine.low %v492_v2, %v493_v3 }
  0x9a   :  { %574 = vst.sshfl [vmem:[%s1024_s6 + $0xc] sm:$0x33 pattern:$0x75316420] %v496_v53 }
  0x9b   :  { %515 = vsyncpa [#allocation3], 1 }
  0x9c   :  { %516 = vsyncpa [#allocation5], 1 }
  0x9d   :  { %517 = vsyncpa [#allocation8], 1 }

</bundles_post_ra>
